<compile_context>
chip_gen: v6e
topology: v6e:2x2x1
jax: 0.10.0
libtpu: 0.0.40
codegen_flags: <defaults>
</compile_context>

<pallas_src>
import functools

import jax
import jax.numpy as jnp
from jax.experimental import pallas as pl
from jax.experimental.pallas import tpu as pltpu


# ------------------------ prep kernel: effective weight --------------------- #
def superconv2d_prep_kernel(w_ref, cmask_ref, cthr_ref, kmask_ref, kthr_ref,
                            wout_ref):
    # w_ref:     (K*K*Cin, Cout) f32   raw weight, HWIO-flattened (matmul layout)
    # cmask_ref: (n_c, Cout)     f32   channel masks
    # cthr_ref:  (1, n_c)        f32   channel thresholds
    # kmask_ref: (K*K*Cin, n_k)  f32   kernel-size masks, expanded over Cin, transposed
    # kthr_ref:  (1, n_k)        f32   kernel thresholds
    # wout_ref:  (K*K*Cin, Cout) mxu_dtype   effective weight
    w = w_ref[...]
    w2 = w * w
    # Precomputed sums of squares: ||w * m||_F^2 == dot(ssq, m^2) since (w*m)^2 = w^2*m^2.
    ssq_c = jnp.sum(w2, axis=0, keepdims=True)      # (1, Cout): per output channel
    ssq_r = jnp.sum(w2, axis=1, keepdims=True)      # (KKC, 1):  per (tap, cin) row

    # ---- parametrized channel mask (recursion unrolled back-to-front) ----
    cmasks = cmask_ref[...]
    cthr = cthr_ref[...]
    col_scale = jnp.zeros_like(ssq_c)               # (1, Cout)
    for i in reversed(range(cmasks.shape[0])):
        m = cmasks[i:i + 1, :]                      # (1, Cout)
        norm = jnp.sqrt(jnp.sum(ssq_c * m * m))
        ind = (norm > cthr[0, i]).astype(jnp.float32)
        col_scale = ind * (m + col_scale)

    # ---- parametrized kernel-size mask (on the Cin-expanded masks) ----
    kmasks = kmask_ref[...]
    kthr = kthr_ref[...]
    row_scale = jnp.zeros_like(ssq_r)               # (KKC, 1)
    for i in reversed(range(kmasks.shape[1])):
        m = kmasks[:, i:i + 1]                      # (KKC, 1)
        norm = jnp.sqrt(jnp.sum(ssq_r * m * m))
        ind = (norm > kthr[0, i]).astype(jnp.float32)
        row_scale = ind * (m + row_scale)

    wout_ref[...] = (w * row_scale * col_scale).astype(wout_ref.dtype)


# --------------------------- conv kernel (per batch) ------------------------ #
def superconv2d_conv_kernel(x_ref, w_ref, b_ref, o_ref, *, k, cin, cout,
                            stride, dilation, mxu_dtype):
    # x_ref: (1, Hp, Wp*Cin)   f32 padded NHWC input, lane-dense flattened
    # w_ref: (K*K*Cin, Cout)   mxu_dtype effective weight (MXU-RHS-ready)
    # b_ref: (1, Cout)         f32 bias
    # o_ref: (1, Ho, Wo*Cout)  lane-dense output block
    ho = o_ref.shape[1]
    wo = o_ref.shape[2] // cout
    hp = x_ref.shape[1]
    wp = x_ref.shape[2] // cin

    x2d = x_ref[0]                                   # (Hp, Wp*Cin)
    if stride != 1:
        x3d = x2d.reshape(hp, wp, cin)               # generic (strided) path only

    # ---- im2col: one column block of width Cin per kernel tap ----
    cols = []
    for kh in range(k):
        h0 = kh * dilation
        for kw in range(k):
            w0 = kw * dilation
            if stride == 1:
                # stride 1: (w, cin) stay contiguous in the flattened last dim.
                sl = jax.lax.slice(x2d, (h0, w0 * cin),
                                   (h0 + ho, (w0 + wo) * cin))       # (Ho, Wo*Cin)
            else:
                sl = jax.lax.slice(
                    x3d, (h0, w0, 0),
                    (h0 + (ho - 1) * stride + 1, w0 + (wo - 1) * stride + 1, cin),
                    (stride, stride, 1))                             # (Ho, Wo, Cin)
            cols.append(sl.reshape(ho * wo, cin))
    im2col = jnp.concatenate(cols, axis=1)           # (Ho*Wo, K*K*Cin)

    # ---- single fused MXU matmul (bf16 operands, f32 accumulation) ----
    acc = jnp.dot(im2col.astype(mxu_dtype), w_ref[...],
                  preferred_element_type=jnp.float32)                # (Ho*Wo, Cout)
    acc = acc + b_ref[...]                                           # f32 bias add

    # lane-dense store: last dim Wo*Cout (128 here) instead of Cout.
    o_ref[...] = acc.reshape(1, ho, wo * cout).astype(o_ref.dtype)


# ------------------------------- wrapper ------------------------------------ #
def super_conv2d(x_nchw, weight, bias, cmasks, cthr, kmasks, kthr,
                 *, padding, stride, dilation, mxu_dtype=jnp.bfloat16):
    n, cin, h, w = x_nchw.shape
    cout, cin_w, k, _ = weight.shape
    assert cin_w == cin, "TODO(synk): groups > 1 not supported"
    hp, wp = h + 2 * padding, w + 2 * padding
    ho = (hp - dilation * (k - 1) - 1) // stride + 1
    wo = (wp - dilation * (k - 1) - 1) // stride + 1
    kkc = k * k * cin
    n_c, n_k = cmasks.shape[0], kmasks.shape[0]

    # ---- one-time, x-independent layout plumbing (outside the hot loop) ----
    w_flat = jnp.transpose(weight, (2, 3, 1, 0)).reshape(kkc, cout)   # HWIO-flat
    w_flat = w_flat.astype(jnp.float32)
    km_exp = jnp.repeat(kmasks.reshape(n_k, k * k).astype(jnp.float32),
                        cin, axis=1).T                                # (KKC, n_k)
    cmasks2 = cmasks.astype(jnp.float32)                              # (n_c, Cout)
    cthr2 = cthr.reshape(1, n_c).astype(jnp.float32)
    kthr2 = kthr.reshape(1, n_k).astype(jnp.float32)
    b2 = bias.reshape(1, cout).astype(jnp.float32)

    # ---- prep kernel: runs ONCE (not per batch element) ----
    w_eff = pl.pallas_call(
        superconv2d_prep_kernel,
        out_shape=jax.ShapeDtypeStruct((kkc, cout), mxu_dtype),
        grid=(1,),
        in_specs=[
            pl.BlockSpec((kkc, cout), lambda i: (0, 0)),
            pl.BlockSpec((n_c, cout), lambda i: (0, 0)),
            pl.BlockSpec((1, n_c), lambda i: (0, 0)),
            pl.BlockSpec((kkc, n_k), lambda i: (0, 0)),
            pl.BlockSpec((1, n_k), lambda i: (0, 0)),
        ],
        out_specs=pl.BlockSpec((kkc, cout), lambda i: (0, 0)),
        compiler_params=pltpu.CompilerParams(
            dimension_semantics=("arbitrary",)),
    )(w_flat, cmasks2, cthr2, km_exp, kthr2)

    # NCHW -> NHWC, spatial pad, flatten (W, Cin) into the lane dim (lane-dense DMA).
    x = jnp.transpose(x_nchw, (0, 2, 3, 1))
    x = jnp.pad(x, ((0, 0), (padding, padding), (padding, padding), (0, 0)))
    x = x.reshape(n, hp, wp * cin).astype(jnp.float32)

    kern = functools.partial(superconv2d_conv_kernel, k=k, cin=cin, cout=cout,
                             stride=stride, dilation=dilation, mxu_dtype=mxu_dtype)

    out_flat = pl.pallas_call(
        kern,
        out_shape=jax.ShapeDtypeStruct((n, ho, wo * cout), x_nchw.dtype),
        grid=(n,),
        in_specs=[
            pl.BlockSpec((1, hp, wp * cin), lambda b: (b, 0, 0)),
            pl.BlockSpec((kkc, cout), lambda b: (0, 0)),
            pl.BlockSpec((1, cout), lambda b: (0, 0)),
        ],
        out_specs=pl.BlockSpec((1, ho, wo * cout), lambda b: (b, 0, 0)),
        compiler_params=pltpu.CompilerParams(
            dimension_semantics=("parallel",),          # batch shards across TCs (v7x)
            vmem_limit_bytes=48 * 1024 * 1024),
    )(x, w_eff, b2)

    # lane-dense (N, Ho, Wo*Cout) -> NCHW to match PyTorch output convention.
    out = out_flat.reshape(n, ho, wo, cout)
    return jnp.transpose(out, (0, 3, 1, 2))


# --------------------- mask construction (matches __init__) ----------------- #
def build_channel_masks(out_channels_list, max_out):
    masks, prev = [], None
    for oc in out_channels_list:
        m = jnp.ones((max_out,), jnp.float32)
        m = m * jnp.pad(jnp.ones((oc,), jnp.float32), (0, max_out - oc))
        if prev:
            m = m * jnp.pad(jnp.zeros((prev,), jnp.float32),
                            (0, max_out - prev), constant_values=1.0)
        prev = oc
        masks.append(m)
    return jnp.stack(masks)                                    # (n_c, max_out)


def build_kernel_masks(kernel_size_list, max_k):
    masks, prev = [], None
    for ks in kernel_size_list:
        p = (max_k - ks) // 2
        m = jnp.ones((max_k, max_k), jnp.float32)
        m = m * jnp.pad(jnp.ones((ks, ks), jnp.float32), ((p, p), (p, p)))
        if prev:
            pp = (max_k - prev) // 2
            m = m * jnp.pad(jnp.zeros((prev, prev), jnp.float32),
                            ((pp, pp), (pp, pp)), constant_values=1.0)
        prev = ks
        masks.append(m)
    return jnp.stack(masks)                                    # (n_k, max_k, max_k)


# ------------------------------ reference ----------------------------------- #
def reference_super_conv2d(x_nchw, weight, bias, cmasks, cthr, kmasks, kthr,
                           *, padding, stride, dilation):
    cout, _, k, _ = weight.shape

    def param_mask(masks, thrs, bshape):
        res = jnp.zeros(masks.shape[1:], jnp.float32)
        for i in reversed(range(masks.shape[0])):
            m = masks[i]
            norm = jnp.sqrt(jnp.sum((weight * m.reshape(bshape)) ** 2))
            ind = (norm > thrs[i]).astype(jnp.float32)
            res = ind * (m + res)
        return res

    cp = param_mask(cmasks, cthr, (cout, 1, 1, 1))             # (Cout,)
    kp = param_mask(kmasks, kthr, (1, 1, k, k))                # (K, K)
    w_eff = weight * cp.reshape(cout, 1, 1, 1) * kp.reshape(1, 1, k, k)
    out = jax.lax.conv_general_dilated(
        x_nchw, w_eff, window_strides=(stride, stride),
        padding=[(padding, padding), (padding, padding)],
        rhs_dilation=(dilation, dilation),
        dimension_numbers=("NCHW", "OIHW", "NCHW"))
    return out + bias.reshape(1, cout, 1, 1)


# --------------------------------- main -------------------------------------- #
if __name__ == "__main__":
    # Module configuration (small, consistent with SuperConv2d.__init__).
    IN_CH = 4
    OUT_CH_LIST = [4, 8]          # -> max_out_channels = 8
    K_LIST = [3, 5]               # -> max_kernel_size = 5
    PADDING, STRIDE, DILATION, GROUPS = 2, 1, 1, 1
    N, H, W = 2, 16, 16
    MAX_OUT, MAX_K = max(OUT_CH_LIST), max(K_LIST)

    key = jax.random.PRNGKey(0)
    kx, kw_, kb = jax.random.split(key, 3)
    x = jax.random.normal(kx, (N, IN_CH, H, W), jnp.float32)          # NCHW input
    weight = 0.1 * jax.random.normal(kw_, (MAX_OUT, IN_CH // GROUPS, MAX_K, MAX_K),
                                     jnp.float32)
    bias = 0.1 * jax.random.normal(kb, (MAX_OUT,), jnp.float32)

    cmasks = build_channel_masks(OUT_CH_LIST, MAX_OUT)                # (2, 8)
    kmasks = build_kernel_masks(K_LIST, MAX_K)                        # (2, 5, 5)
    # Deterministic thresholds: keep the first channel group / 3x3 center,
    # prune the extra channels and the outer 5x5 ring (exercises indicator=0).
    cthr = jnp.array([0.0, 1e6], jnp.float32)
    kthr = jnp.array([0.0, 1e6], jnp.float32)

    ref = reference_super_conv2d(x, weight, bias, cmasks, cthr, kmasks, kthr,
                                 padding=PADDING, stride=STRIDE, dilation=DILATION)
    ref = jax.block_until_ready(ref)

    # Exactness check: f32 MXU operands (same precision class as the XLA reference).
    out_f32 = super_conv2d(x, weight, bias, cmasks, cthr, kmasks, kthr,
                           padding=PADDING, stride=STRIDE, dilation=DILATION,
                           mxu_dtype=jnp.float32)
    out_f32 = jax.block_until_ready(out_f32)
    assert out_f32.shape == (N, MAX_OUT, H, W), out_f32.shape
    assert jnp.allclose(out_f32, ref, atol=1e-4, rtol=1e-4), float(
        jnp.max(jnp.abs(out_f32 - ref)))

    # Performance configuration: bf16 MXU operands, f32 accumulation.
    # Tolerance reflects bf16 input rounding (~2^-9 relative per operand).
    out_bf16 = super_conv2d(x, weight, bias, cmasks, cthr, kmasks, kthr,
                            padding=PADDING, stride=STRIDE, dilation=DILATION,
                            mxu_dtype=jnp.bfloat16)
    out_bf16 = jax.block_until_ready(out_bf16)
    assert out_bf16.shape == (N, MAX_OUT, H, W), out_bf16.shape
    assert jnp.allclose(out_bf16, ref, atol=3e-2, rtol=3e-2), float(
        jnp.max(jnp.abs(out_bf16 - ref)))

    print("KERNEL_OK")
</pallas_src>

<mosaic_0001>
module attributes {stable_mosaic.version = 11 : i64} {
  func.func @superconv2d_prep_kernel(%arg0: i32, %arg1: memref<100x8xf32, #tpu.memory_space<vmem>>, %arg2: memref<2x8xf32, #tpu.memory_space<vmem>>, %arg3: memref<1x2xf32, #tpu.memory_space<vmem>>, %arg4: memref<100x2xf32, #tpu.memory_space<vmem>>, %arg5: memref<1x2xf32, #tpu.memory_space<vmem>>, %arg6: memref<100x8xf32, #tpu.memory_space<vmem>>) attributes {dimension_semantics = [#tpu.dimension_semantics<arbitrary>], iteration_bounds = array<i64: 1>, scalar_prefetch = 0 : i64, scratch_operands = 0 : i64, tpu.core_type = #tpu.core_type<tc>, window_params = [{pipeline_mode = #tpu.pipeline_mode<synchronous>, transform_indices = @transform_0, window_bounds = array<i64: 100, 8>}, {pipeline_mode = #tpu.pipeline_mode<synchronous>, transform_indices = @transform_1, window_bounds = array<i64: 2, 8>}, {pipeline_mode = #tpu.pipeline_mode<synchronous>, transform_indices = @transform_2, window_bounds = array<i64: 1, 2>}, {pipeline_mode = #tpu.pipeline_mode<synchronous>, transform_indices = @transform_3, window_bounds = array<i64: 100, 2>}, {pipeline_mode = #tpu.pipeline_mode<synchronous>, transform_indices = @transform_4, window_bounds = array<i64: 1, 2>}, {pipeline_mode = #tpu.pipeline_mode<synchronous>, transform_indices = @transform_5, window_bounds = array<i64: 100, 8>}]} {
    %c0 = arith.constant 0 : index
    %c0_0 = arith.constant 0 : index
    %0 = vector.load %arg1[%c0, %c0_0] : memref<100x8xf32, #tpu.memory_space<vmem>>, vector<100x8xf32>
    %1 = arith.mulf %0, %0 : vector<100x8xf32>
    %cst = arith.constant dense<0.000000e+00> : vector<8xf32>
    %2 = vector.multi_reduction <add>, %1, %cst [0] : vector<100x8xf32> to vector<8xf32>
    %3 = vector.shape_cast %2 : vector<8xf32> to vector<1x8xf32>
    %cst_1 = arith.constant dense<0.000000e+00> : vector<100xf32>
    %4 = vector.multi_reduction <add>, %1, %cst_1 [1] : vector<100x8xf32> to vector<100xf32>
    %5 = vector.shape_cast %4 : vector<100xf32> to vector<100x1xf32>
    %c0_2 = arith.constant 0 : index
    %c0_3 = arith.constant 0 : index
    %6 = vector.load %arg2[%c0_2, %c0_3] : memref<2x8xf32, #tpu.memory_space<vmem>>, vector<2x8xf32>
    %c0_4 = arith.constant 0 : index
    %c0_5 = arith.constant 0 : index
    %7 = vector.load %arg3[%c0_4, %c0_5] : memref<1x2xf32, #tpu.memory_space<vmem>>, vector<1x2xf32>
    %cst_6 = arith.constant 0.000000e+00 : f32
    %8 = vector.broadcast %cst_6 : f32 to vector<1x8xf32>
    %9 = vector.extract_strided_slice %6 {offsets = [1, 0], sizes = [1, 8], strides = [1, 1]} : vector<2x8xf32> to vector<1x8xf32>
    %10 = arith.mulf %3, %9 : vector<1x8xf32>
    %11 = arith.mulf %10, %9 : vector<1x8xf32>
    %12 = vector.shape_cast %11 : vector<1x8xf32> to vector<1x1x8xf32>
    %cst_7 = arith.constant dense<0.000000e+00> : vector<1xf32>
    %13 = vector.multi_reduction <add>, %12, %cst_7 [1, 2] : vector<1x1x8xf32> to vector<1xf32>
    %14 = vector.shape_cast %13 : vector<1xf32> to vector<1x1x1xf32>
    %15 = vector.extract %14[0, 0, 0] : f32 from vector<1x1x1xf32>
    %16 = math.sqrt %15 : f32
    %17 = vector.extract_strided_slice %7 {offsets = [0, 1], sizes = [1, 1], strides = [1, 1]} : vector<1x2xf32> to vector<1x1xf32>
    %18 = vector.extract %17[0, 0] : f32 from vector<1x1xf32>
    %19 = arith.cmpf ogt, %16, %18 : f32
    %20 = arith.extui %19 : i1 to i32
    %21 = arith.sitofp %20 : i32 to f32
    %22 = arith.addf %9, %8 : vector<1x8xf32>
    %23 = vector.broadcast %21 : f32 to vector<1x8xf32>
    %24 = arith.mulf %23, %22 : vector<1x8xf32>
    %25 = vector.extract_strided_slice %6 {offsets = [0, 0], sizes = [1, 8], strides = [1, 1]} : vector<2x8xf32> to vector<1x8xf32>
    %26 = arith.mulf %3, %25 : vector<1x8xf32>
    %27 = arith.mulf %26, %25 : vector<1x8xf32>
    %28 = vector.shape_cast %27 : vector<1x8xf32> to vector<1x1x8xf32>
    %cst_8 = arith.constant dense<0.000000e+00> : vector<1xf32>
    %29 = vector.multi_reduction <add>, %28, %cst_8 [1, 2] : vector<1x1x8xf32> to vector<1xf32>
    %30 = vector.shape_cast %29 : vector<1xf32> to vector<1x1x1xf32>
    %31 = vector.extract %30[0, 0, 0] : f32 from vector<1x1x1xf32>
    %32 = math.sqrt %31 : f32
    %33 = vector.extract_strided_slice %7 {offsets = [0, 0], sizes = [1, 1], strides = [1, 1]} : vector<1x2xf32> to vector<1x1xf32>
    %34 = vector.extract %33[0, 0] : f32 from vector<1x1xf32>
    %35 = arith.cmpf ogt, %32, %34 : f32
    %36 = arith.extui %35 : i1 to i32
    %37 = arith.sitofp %36 : i32 to f32
    %38 = arith.addf %25, %24 : vector<1x8xf32>
    %39 = vector.broadcast %37 : f32 to vector<1x8xf32>
    %40 = arith.mulf %39, %38 : vector<1x8xf32>
    %c0_9 = arith.constant 0 : index
    %c0_10 = arith.constant 0 : index
    %41 = vector.load %arg4[%c0_9, %c0_10] : memref<100x2xf32, #tpu.memory_space<vmem>>, vector<100x2xf32>
    %c0_11 = arith.constant 0 : index
    %c0_12 = arith.constant 0 : index
    %42 = vector.load %arg5[%c0_11, %c0_12] : memref<1x2xf32, #tpu.memory_space<vmem>>, vector<1x2xf32>
    %cst_13 = arith.constant 0.000000e+00 : f32
    %43 = vector.broadcast %cst_13 : f32 to vector<100x1xf32>
    %44 = vector.extract_strided_slice %41 {offsets = [0, 1], sizes = [100, 1], strides = [1, 1]} : vector<100x2xf32> to vector<100x1xf32>
    %45 = arith.mulf %5, %44 : vector<100x1xf32>
    %46 = arith.mulf %45, %44 : vector<100x1xf32>
    %47 = vector.shape_cast %46 : vector<100x1xf32> to vector<1x100x1xf32>
    %cst_14 = arith.constant dense<0.000000e+00> : vector<1xf32>
    %48 = vector.multi_reduction <add>, %47, %cst_14 [1, 2] : vector<1x100x1xf32> to vector<1xf32>
    %49 = vector.shape_cast %48 : vector<1xf32> to vector<1x1x1xf32>
    %50 = vector.extract %49[0, 0, 0] : f32 from vector<1x1x1xf32>
    %51 = math.sqrt %50 : f32
    %52 = vector.extract_strided_slice %42 {offsets = [0, 1], sizes = [1, 1], strides = [1, 1]} : vector<1x2xf32> to vector<1x1xf32>
    %53 = vector.extract %52[0, 0] : f32 from vector<1x1xf32>
    %54 = arith.cmpf ogt, %51, %53 : f32
    %55 = arith.extui %54 : i1 to i32
    %56 = arith.sitofp %55 : i32 to f32
    %57 = arith.addf %44, %43 : vector<100x1xf32>
    %58 = vector.broadcast %56 : f32 to vector<100x1xf32>
    %59 = arith.mulf %58, %57 : vector<100x1xf32>
    %60 = vector.extract_strided_slice %41 {offsets = [0, 0], sizes = [100, 1], strides = [1, 1]} : vector<100x2xf32> to vector<100x1xf32>
    %61 = arith.mulf %5, %60 : vector<100x1xf32>
    %62 = arith.mulf %61, %60 : vector<100x1xf32>
    %63 = vector.shape_cast %62 : vector<100x1xf32> to vector<1x100x1xf32>
    %cst_15 = arith.constant dense<0.000000e+00> : vector<1xf32>
    %64 = vector.multi_reduction <add>, %63, %cst_15 [1, 2] : vector<1x100x1xf32> to vector<1xf32>
    %65 = vector.shape_cast %64 : vector<1xf32> to vector<1x1x1xf32>
    %66 = vector.extract %65[0, 0, 0] : f32 from vector<1x1x1xf32>
    %67 = math.sqrt %66 : f32
    %68 = vector.extract_strided_slice %42 {offsets = [0, 0], sizes = [1, 1], strides = [1, 1]} : vector<1x2xf32> to vector<1x1xf32>
    %69 = vector.extract %68[0, 0] : f32 from vector<1x1xf32>
    %70 = arith.cmpf ogt, %67, %69 : f32
    %71 = arith.extui %70 : i1 to i32
    %72 = arith.sitofp %71 : i32 to f32
    %73 = arith.addf %60, %59 : vector<100x1xf32>
    %74 = vector.broadcast %72 : f32 to vector<100x1xf32>
    %75 = arith.mulf %74, %73 : vector<100x1xf32>
    %76 = vector.broadcast %75 : vector<100x1xf32> to vector<100x8xf32>
    %77 = arith.mulf %0, %76 : vector<100x8xf32>
    %78 = vector.broadcast %40 : vector<1x8xf32> to vector<100x8xf32>
    %79 = arith.mulf %77, %78 : vector<100x8xf32>
    %c0_16 = arith.constant 0 : index
    %c0_17 = arith.constant 0 : index
    %80 = vector.load %arg6[%c0_16, %c0_17] : memref<100x8xf32, #tpu.memory_space<vmem>>, vector<100x8xf32>
    tpu.vector_store %arg6[%c0_16, %c0_17], %79 {strides = array<i32>} : memref<100x8xf32, #tpu.memory_space<vmem>>, vector<100x8xf32>,
    return
  }
  func.func @transform_0(%arg0: i32) -> (i32, i32) {
    %c0_i32 = arith.constant 0 : i32
    %c0_i32_0 = arith.constant 0 : i32
    %c0_i32_1 = arith.constant 0 : i32
    return %c0_i32, %c0_i32_0 : i32, i32
  }
  func.func @transform_1(%arg0: i32) -> (i32, i32) {
    %c0_i32 = arith.constant 0 : i32
    %c0_i32_0 = arith.constant 0 : i32
    %c0_i32_1 = arith.constant 0 : i32
    return %c0_i32, %c0_i32_0 : i32, i32
  }
  func.func @transform_2(%arg0: i32) -> (i32, i32) {
    %c0_i32 = arith.constant 0 : i32
    %c0_i32_0 = arith.constant 0 : i32
    %c0_i32_1 = arith.constant 0 : i32
    return %c0_i32, %c0_i32_0 : i32, i32
  }
  func.func @transform_3(%arg0: i32) -> (i32, i32) {
    %c0_i32 = arith.constant 0 : i32
    %c0_i32_0 = arith.constant 0 : i32
    %c0_i32_1 = arith.constant 0 : i32
    return %c0_i32, %c0_i32_0 : i32, i32
  }
  func.func @transform_4(%arg0: i32) -> (i32, i32) {
    %c0_i32 = arith.constant 0 : i32
    %c0_i32_0 = arith.constant 0 : i32
    %c0_i32_1 = arith.constant 0 : i32
    return %c0_i32, %c0_i32_0 : i32, i32
  }
  func.func @transform_5(%arg0: i32) -> (i32, i32) {
    %c0_i32 = arith.constant 0 : i32
    %c0_i32_0 = arith.constant 0 : i32
    %c0_i32_1 = arith.constant 0 : i32
    return %c0_i32, %c0_i32_0 : i32, i32
  }
}

</mosaic_0001>

<bundles_post_ra>
// kernel: tpu_custom_call.1
= control target key start
LH: loop header
LB: loop body
LE: loop exit
PB: predicated region body
PF: predicated region fallthrough
CT: control target
= control target key end

     0   :  { %vm46_vm0 = vcmask 64512   ;;  %vm70_vm1 = vcmask 60416   ;;  %vm112_vm2 = vcmask 57344   ;;  %vm262_vm3 = vcmask 7168   ;;  %s614_s25 = smov 127   ;;  %s1015_s0 = inlined_call_operand.vmem [shape: f32[100,8], index: 0, kind: input, shape index: {}]   ;;  %s1016_s1 = inlined_call_operand.vmem [shape: f32[2,8], index: 1, kind: input, shape index: {}]   ;;  %s1017_s3 = inlined_call_operand.vmem [shape: f32[100,2], index: 3, kind: input, shape index: {}]   ;;  %s1018_s2 = inlined_call_operand.vmem [shape: f32[1,2], index: 2, kind: input, shape index: {}]   ;;  %s1019_s4 = inlined_call_operand.vmem [shape: f32[1,2], index: 4, kind: input, shape index: {}]   ;;  %s1020_s5 = inlined_call_operand.vmem [shape: f32[100,8], index: 5, kind: output, shape index: {}]  }
   0x1   :  { %v649_v0 = vld [vmem:[%s1015_s0] sm:$0xff]  ;;  %v654_v1 = vld [vmem:[%s1015_s0 + $0x8] sm:$0xff]  ;;  %v659_v2 = vld [vmem:[%s1015_s0 + $0x10] sm:$0xff]  ;;  %vm286_vm4 = vcmask 3072  }
   0x2   :  { %v33_v3 = vmul.f32 %v649_v0, %v649_v0  ;;  %v34_v4 = vmul.f32 %v654_v1, %v654_v1  ;;  %v35_v5 = vmul.f32 %v659_v2, %v659_v2  ;;  %v670_v6 = vld [vmem:[%s1015_s0 + $0x20] sm:$0xff]  ;;  %v675_v7 = vld [vmem:[%s1015_s0 + $0x18] sm:$0xff]  ;;  %v682_v9 = vld [vmem:[%s1015_s0 + $0x28] sm:$0xff] }
   0x3   :  { %v36_v8 = vmul.f32 %v675_v7, %v675_v7  ;;  %v37_v13 = vmul.f32 %v670_v6, %v670_v6  ;;  %v692_v15 = vld [vmem:[%s1015_s0 + $0x30] sm:$0xff]  ;;  %v38_v17 = vmul.f32 %v682_v9, %v682_v9  ;;  %v700_v19 = vld [vmem:[%s1015_s0 + $0x38] sm:$0xff]  ;;  %v708_v23 = vld [vmem:[%s1015_s0 + $0x40] sm:$0xff] }
   0x4   :  { %v47_v10 = vsel %vm46_vm0, %v33_v3, 0.0  ;;  %v48_v11 = vsel %vm46_vm0, %v34_v4, 0.0  ;;  %v50_v12 = vsel %vm46_vm0, %v35_v5, 0.0  ;;  %v39_v21 = vmul.f32 %v692_v15, %v692_v15  ;;  %v716_v27 = vld [vmem:[%s1015_s0 + $0x48] sm:$0xff]  ;;  %v724_v31 = vld [vmem:[%s1015_s0 + $0x50] sm:$0xff]  ;;  %v732_v35 = vld [vmem:[%s1015_s0 + $0x58] sm:$0xff] }
   0x5   :  { %79 = vadd.xlane.f32.xlu0 %v47_v10  ;;  %v49_v14 = vadd.f32 %v48_v11, %v47_v10  ;;  %83 = vadd.xlane.f32.xlu1 %v50_v12  ;;  %v52_v16 = vsel %vm46_vm0, %v36_v8, 0.0  ;;  %v54_v20 = vsel %vm46_vm0, %v37_v13, 0.0  ;;  %v56_v24 = vsel %vm46_vm0, %v38_v17, 0.0  ;;  %v740_v39 = vld [vmem:[%s1015_s0 + $0x60] sm:$0xf]  ;;  %v768_v8 = vld [vmem:[%s1017_s3 + $0x10] sm:$0xff] }
   0x6   :  { %v40_v25 = vmul.f32 %v700_v19, %v700_v19  ;;  %v58_v28 = vsel %vm46_vm0, %v39_v21, 0.0  ;;  %v41_v29 = vmul.f32 %v708_v23, %v708_v23  ;;  %v42_v33 = vmul.f32 %v716_v27, %v716_v27  ;;  %v753_v56 = vld [vmem:[%s1016_s1] sm:$0x3]  ;;  %v773_v10 = vld [vmem:[%s1017_s3 + $0x8] sm:$0xff]  ;;  %v782_v17 = vld [vmem:[%s1017_s3 + $0x18] sm:$0xff] }
   0x7   :  { %v51_v18 = vadd.f32 %v50_v12, %v49_v14  ;;  %v43_v37 = vmul.f32 %v724_v31, %v724_v31  ;;  %v44_v41 = vmul.f32 %v732_v35, %v732_v35  ;;  %v45_v44 = vmul.f32 %v740_v39, %v740_v39  ;;  %v762_v63 = vld [vmem:[%s1017_s3] sm:$0xff] }
   0x8   :  { %v60_v32 = vsel %vm46_vm0, %v40_v25, 0.0  ;;  %v62_v36 = vsel %vm46_vm0, %v41_v29, 0.0  ;;  %v64_v40 = vsel %vm46_vm0, %v42_v33, 0.0 }
   0x9   :  { %81 = vadd.xlane.f32.xlu0 %v48_v11  ;;  %85 = vadd.xlane.f32.xlu1 %v52_v16  ;;  %v53_v22 = vadd.f32 %v52_v16, %v51_v18  ;;  %v66_v43 = vsel %vm46_vm0, %v43_v37, 0.0  ;;  %v68_v46 = vsel %vm46_vm0, %v44_v41, 0.0  ;;  %v71_v48 = vsel %vm70_vm1, %v45_v44, 0.0  ;;  %v787_v18 = vld [vmem:[%s1017_s3 + $0x20] sm:$0xff] }
   0xb   :  { %v55_v26 = vadd.f32 %v54_v20, %v53_v22 }
   0xd   :  { %87 = vadd.xlane.f32.xlu0 %v54_v20  ;;  %89 = vadd.xlane.f32.xlu1 %v56_v24  ;;  %v57_v30 = vadd.f32 %v56_v24, %v55_v26 }
   0xf   :  { %v59_v34 = vadd.f32 %v58_v28, %v57_v30  ;;  %v799_v30 = vld [vmem:[%s1017_s3 + $0x30] sm:$0xff] }
  0x11   :  { %91 = vadd.xlane.f32.xlu0 %v58_v28  ;;  %93 = vadd.xlane.f32.xlu1 %v60_v32  ;;  %v61_v38 = vadd.f32 %v60_v32, %v59_v34  ;;  %v804_v32 = vld [vmem:[%s1017_s3 + $0x28] sm:$0xff] }
  0x13   :  { %v63_v42 = vadd.f32 %v62_v36, %v61_v38 }
  0x15   :  { %95 = vadd.xlane.f32.xlu0 %v62_v36  ;;  %97 = vadd.xlane.f32.xlu1 %v64_v40  ;;  %v65_v45 = vadd.f32 %v64_v40, %v63_v42  ;;  %v816_v42 = vld [vmem:[%s1017_s3 + $0x38] sm:$0xff] }
  0x17   :  { %v67_v47 = vadd.f32 %v66_v43, %v65_v45 }
  0x19   :  { %99 = vadd.xlane.f32.xlu0 %v66_v43  ;;  %v69_v49 = vadd.f32 %v68_v46, %v67_v47 }
  0x1b   :  { %v72_v50 = vadd.f32 %v71_v48, %v69_v49 }
  0x1d   :  { %101 = vadd.xlane.f32.xlu0 %v68_v46  ;;  %v73_v51 = vrot.slane %v72_v50, 4 }
  0x1f   :  { %v74_v52 = vadd.f32 %v73_v51, %v72_v50  ;;  %v828_v51 = vld [vmem:[%s1017_s3 + $0x40] sm:$0xff] }
  0x21   :  { %v75_v53 = vrot.slane %v74_v52, 2 }
  0x23   :  { %v76_v54 = vadd.f32 %v75_v53, %v74_v52 }
  0x25   :  { %v77_v55 = vrot.slane %v76_v54, 1 }
  0x27   :  { %v78_v57 = vadd.f32 %v77_v55, %v76_v54 }
  0x29   :  { %v107_v58 = vmul.f32 %v753_v56, %v78_v57 }
  0x2b   :  { %v108_v59 = vmul.f32 %v107_v58, %v753_v56  ;;  %v837_v58 = vld [vmem:[%s1017_s3 + $0x48] sm:$0xff] }
  0x2d   :  { %v110_v60 = vrot.slane %v108_v59, 1  ;;  %v757_v62 = vsel %vm112_vm2, %v108_v59, 0.0 }
  0x2f   :  { %v113_v61 = vsel %vm112_vm2, %v110_v60, 0.0 }
  0x30   :  { %114 = vadd.xlane.f32.xlu1 %v113_v61 }
  0x34   :  { %103 = vadd.xlane.f32.xlu1 %v71_v48 }
  0x8e   :  { %v80_v3 = vpop.xlane.xlu0 %79  ;;  %v84_v4 = vpop.xlane.xlu1 %83 }
  0x8f   :  { %v184_v5 = vmul.f32 %v762_v63, %v80_v3  ;;  %v186_v13 = vmul.f32 %v768_v8, %v84_v4 }
  0x91   :  { %v197_v11 = vmul.f32 %v184_v5, %v762_v63  ;;  %v199_v22 = vmul.f32 %v186_v13, %v768_v8 }
  0x92   :  { %v82_v12 = vpop.xlane.xlu0 %81  ;;  %v86_v14 = vpop.xlane.xlu1 %85 }
  0x93   :  { %v185_v16 = vmul.f32 %v773_v10, %v82_v12  ;;  %223 = vrot.lane.b32.xlu0 %v197_v11, %s614_s25  ;;  %v340_v21 = vsel %vm262_vm3, %v197_v11, 0.0  ;;  %v187_v25 = vmul.f32 %v782_v17, %v86_v14  ;;  %v343_v36 = vsel %vm262_vm3, %v199_v22, 0.0  ;;  %v846_v11 = vld [vmem:[%s1017_s3 + $0x50] sm:$0xff] }
  0x95   :  { %v198_v20 = vmul.f32 %v185_v16, %v773_v10  ;;  %v200_v37 = vmul.f32 %v187_v25, %v782_v17 }
  0x96   :  { %v88_v24 = vpop.xlane.xlu0 %87  ;;  %v90_v26 = vpop.xlane.xlu1 %89 }
  0x97   :  { %v341_v28 = vsel %vm262_vm3, %v198_v20, 0.0  ;;  %v188_v29 = vmul.f32 %v787_v18, %v88_v24  ;;  %225 = vrot.lane.b32.xlu1 %v198_v20, %s614_s25  ;;  %v189_v41 = vmul.f32 %v804_v32, %v90_v26  ;;  %v345_v46 = vsel %vm262_vm3, %v200_v37, 0.0  ;;  %v855_v20 = vld [vmem:[%s1017_s3 + $0x58] sm:$0xff] }
  0x98   :  { %v342_v33 = vadd.f32 %v341_v28, %v340_v21 }
  0x99   :  { %v201_v34 = vmul.f32 %v188_v29, %v787_v18  ;;  %v202_v47 = vmul.f32 %v189_v41, %v804_v32 }
  0x9a   :  { %v92_v38 = vpop.xlane.xlu0 %91  ;;  %v94_v43 = vpop.xlane.xlu1 %93  ;;  %v344_v44 = vadd.f32 %v343_v36, %v342_v33 }
  0x9b   :  { %v190_v40 = vmul.f32 %v799_v30, %v92_v38  ;;  %231 = vrot.lane.b32.xlu0 %v201_v34, %s614_s25  ;;  %227 = vrot.lane.b32.xlu1 %v199_v22, %s614_s25  ;;  %v191_v48 = vmul.f32 %v816_v42, %v94_v43  ;;  %v347_v50 = vsel %vm262_vm3, %v201_v34, 0.0  ;;  %v349_v57 = vsel %vm262_vm3, %v202_v47, 0.0 }
  0x9c   :  { %v346_v49 = vadd.f32 %v345_v46, %v344_v44 }
  0x9d   :  { %v203_v45 = vmul.f32 %v190_v40, %v799_v30  ;;  %v204_v53 = vmul.f32 %v191_v48, %v816_v42  ;;  %v869_v40 = vld [vmem:[%s1017_s3 + $0x60] sm:$0xf] }
  0x9e   :  { %v96_v52 = vpop.xlane.xlu0 %95  ;;  %v348_v54 = vadd.f32 %v347_v50, %v346_v49  ;;  %v98_v59 = vpop.xlane.xlu1 %97 }
  0x9f   :  { %235 = vrot.lane.b32.xlu0 %v203_v45, %s614_s25  ;;  %229 = vrot.lane.b32.xlu1 %v200_v37, %s614_s25  ;;  %v192_v55 = vmul.f32 %v828_v51, %v96_v52  ;;  %v193_v4 = vmul.f32 %v837_v58, %v98_v59  ;;  %v351_v5 = vsel %vm262_vm3, %v203_v45, 0.0  ;;  %v353_v16 = vsel %vm262_vm3, %v204_v53, 0.0 }
  0xa0   :  { %v350_v61 = vadd.f32 %v349_v57, %v348_v54 }
  0xa1   :  { %v205_v3 = vmul.f32 %v192_v55, %v828_v51  ;;  %v206_v13 = vmul.f32 %v193_v4, %v837_v58  ;;  %v880_v55 = vld [vmem:[%s1018_s2] sm:$0x1] }
  0xa2   :  { %v100_v60 = vpop.xlane.xlu0 %99  ;;  %v352_v12 = vadd.f32 %v351_v5, %v350_v61 }
  0xa3   :  { %233 = vrot.lane.b32.xlu1 %v202_v47, %s614_s25  ;;  %v194_v14 = vmul.f32 %v846_v11, %v100_v60  ;;  %v355_v26 = vsel %vm262_vm3, %v205_v3, 0.0  ;;  %v357_v33 = vsel %vm262_vm3, %v206_v13, 0.0 }
  0xa4   :  { %v354_v22 = vadd.f32 %v353_v16, %v352_v12 }
  0xa5   :  { %v207_v24 = vmul.f32 %v194_v14, %v846_v11 }
  0xa6   :  { %v102_v21 = vpop.xlane.xlu0 %101  ;;  %v356_v28 = vadd.f32 %v355_v26, %v354_v22 }
  0xa7   :  { %237 = vrot.lane.b32.xlu1 %v204_v53, %s614_s25  ;;  %v195_v25 = vmul.f32 %v855_v20, %v102_v21  ;;  %v359_v37 = vsel %vm262_vm3, %v207_v24, 0.0 }
  0xa8   :  { %v358_v34 = vadd.f32 %v357_v33, %v356_v28 }
  0xa9   :  { %v208_v29 = vmul.f32 %v195_v25, %v855_v20 }
  0xaa   :  { %v360_v44 = vadd.f32 %v359_v37, %v358_v34  ;;  %v891_v34 = vld [vmem:[%s1019_s4] sm:$0x1] }
  0xab   :  { %239 = vrot.lane.b32.xlu1 %v205_v3, %s614_s25  ;;  %v361_v47 = vsel %vm262_vm3, %v208_v29, 0.0 }
  0xac   :  { %v362_v50 = vadd.f32 %v361_v47, %v360_v44 }
  0xaf   :  { %241 = vrot.lane.b32.xlu1 %v206_v13, %s614_s25 }
  0xb3   :  { %243 = vrot.lane.b32.xlu1 %v207_v24, %s614_s25 }
  0xb7   :  { %245 = vrot.lane.b32.xlu1 %v208_v29, %s614_s25 }
  0xb9   :  { %v115_v36 = vpop.xlane.xlu1 %114 }
  0xba   :  { %v116_v38 = vrot.slane %v115_v36, 4 }
  0xbc   :  { %v117_v41 = vadd.f32 %v116_v38, %v115_v36 }
  0xbd   :  { %v104_v43 = vpop.xlane.xlu1 %103 }
  0xbe   :  { %v118_v45 = vrot.slane %v117_v41, 2  ;;  %v196_v46 = vmul.f32 %v869_v40, %v104_v43  ;;  %142 = vadd.xlane.f32.xlu0 %v757_v62 }
  0xc0   :  { %v209_v48 = vmul.f32 %v196_v46, %v869_v40  ;;  %v119_v49 = vadd.f32 %v118_v45, %v117_v41 }
  0xc2   :  { %247 = vrot.lane.b32.xlu1 %v209_v48, %s614_s25  ;;  %v363_v52 = vsel %vm286_vm4, %v209_v48, 0.0  ;;  %v120_v53 = vrot.slane %v119_v49, 1 }
  0xc3   :  { %v364_v54 = vadd.f32 %v363_v52, %v362_v50 }
  0xc4   :  { %v121_v57 = vadd.f32 %v120_v53, %v119_v49 }
  0xc5   :  { %365 = vadd.xlane.f32.xlu0 %v364_v54 }
  0xc6   :  { %578 = vpush %v121_v57  ;;  %132 = vrot.lane.b32.xlu1 %v880_v55, %s614_s25 }
  0xdb   :  { %307 = vrot.lane.b32.xlu0 %v891_v34, %s614_s25 }
  0xf7   :  { %s579_s21 = spop %578 }
  0xf8   :  { %v123_v62 = vstv %s579_s21 }
  0xf9   :  { %606 = vrsqrt.f32 %v123_v62  ;;  %vm126_vm5 = vcmp.eq.f32.partialorder %v123_v62, inf  ;;  %v129_v61 = vand.u32 2147483648, %v123_v62  ;;  %vm128_vm6 = vcmp.eq.f32.partialorder %v123_v62, 0.0 }
 0x105   :  { %v224_v13 = vpop.permute.xlu0 %223 }
 0x106   :  { %v607_v59 = vpop.eup %606  ;;  %v263_v16 = vsel %vm262_vm3, %v224_v13, 0.0 }
 0x107   :  { %v125_v60 = vmul.f32 %v607_v59, %v123_v62 }
 0x109   :  { %v226_v3 = vpop.permute.xlu1 %225  ;;  %v127_v4 = vsel %vm126_vm5, %v123_v62, %v125_v60 }
 0x10a   :  { %v130_v5 = vsel %vm128_vm6, %v129_v61, %v127_v4  ;;  %v264_v14 = vsel %vm262_vm3, %v226_v3, 0.0 }
 0x10b   :  { %580 = vpush %v130_v5  ;;  %v265_v22 = vadd.f32 %v264_v14, %v263_v16 }
 0x10d   :  { %v228_v12 = vpop.permute.xlu1 %227  ;;  %v232_v33 = vpop.permute.xlu0 %231 }
 0x10e   :  { %v266_v24 = vsel %vm262_vm3, %v228_v12, 0.0  ;;  %v270_v37 = vsel %vm262_vm3, %v232_v33, 0.0 }
 0x10f   :  { %v267_v26 = vadd.f32 %v266_v24, %v265_v22 }
 0x111   :  { %v230_v21 = vpop.permute.xlu1 %229  ;;  %v236_v44 = vpop.permute.xlu0 %235 }
 0x112   :  { %v268_v28 = vsel %vm262_vm3, %v230_v21, 0.0  ;;  %v274_v47 = vsel %vm262_vm3, %v236_v44, 0.0 }
 0x113   :  { %v269_v36 = vadd.f32 %v268_v28, %v267_v26 }
 0x115   :  { %v234_v25 = vpop.permute.xlu1 %233  ;;  %v271_v41 = vadd.f32 %v270_v37, %v269_v36 }
 0x116   :  { %v272_v43 = vsel %vm262_vm3, %v234_v25, 0.0 }
 0x117   :  { %v273_v46 = vadd.f32 %v272_v43, %v271_v41 }
 0x119   :  { %v238_v29 = vpop.permute.xlu1 %237  ;;  %v275_v48 = vadd.f32 %v274_v47, %v273_v46 }
 0x11a   :  { %v276_v50 = vsel %vm262_vm3, %v238_v29, 0.0 }
 0x11b   :  { %v277_v53 = vadd.f32 %v276_v50, %v275_v48 }
 0x11d   :  { %v240_v38 = vpop.permute.xlu1 %239 }
 0x11e   :  { %v278_v52 = vsel %vm262_vm3, %v240_v38, 0.0 }
 0x11f   :  { %v279_v57 = vadd.f32 %v278_v52, %v277_v53 }
 0x121   :  { %v242_v45 = vpop.permute.xlu1 %241 }
 0x122   :  { %v280_v54 = vsel %vm262_vm3, %v242_v45, 0.0 }
 0x123   :  { %v281_v60 = vadd.f32 %v280_v54, %v279_v57 }
 0x125   :  { %v244_v49 = vpop.permute.xlu1 %243 }
 0x126   :  { %v282_v59 = vsel %vm262_vm3, %v244_v49, 0.0 }
 0x127   :  { %v283_v3 = vadd.f32 %v282_v59, %v281_v60 }
 0x129   :  { %v246_v62 = vpop.permute.xlu1 %245 }
 0x12a   :  { %v284_v61 = vsel %vm262_vm3, %v246_v62, 0.0 }
 0x12b   :  { %v285_v4 = vadd.f32 %v284_v61, %v283_v3 }
 0x134   :  { %v248_v5 = vpop.permute.xlu1 %247 }
 0x135   :  { %v287_v12 = vsel %vm286_vm4, %v248_v5, 0.0 }
 0x136   :  { %v288_v13 = vadd.f32 %v287_v12, %v285_v4 }
 0x138   :  { %289 = vadd.xlane.f32.xlu1 %v288_v13  ;;  %v133_v14 = vpop.permute.xlu1 %132 }
 0x139   :  { %582 = vpush %v133_v14 }
 0x13c   :  { %s581_s4 = spop %580 }
 0x147   :  { %v143_v16 = vpop.xlane.xlu0 %142 }
 0x148   :  { %v144_v21 = vrot.slane %v143_v16, 4 }
 0x14a   :  { %v145_v22 = vadd.f32 %v144_v21, %v143_v16 }
 0x14c   :  { %v146_v24 = vrot.slane %v145_v22, 2 }
 0x14e   :  { %v147_v25 = vadd.f32 %v146_v24, %v145_v22  ;;  %v366_v62 = vpop.xlane.xlu0 %365  ;;  %v615_v24 = vmov 0  }
 0x14f   :  { %v367_v59 = vrot.slane %v366_v62, 4  ;;  %604 = vset.pattern.permute.xlu1 %v615_v24  ;;  %605 = vset.pattern.permute.xlu0 %v615_v24 }
 0x150   :  { %v148_v26 = vrot.slane %v147_v25, 1 }
 0x151   :  { %v368_v61 = vadd.f32 %v367_v59, %v366_v62 }
 0x152   :  { %v149_v28 = vadd.f32 %v148_v26, %v147_v25  ;;  %v308_v16 = vpop.permute.xlu0 %307 }
 0x153   :  { %v369_v3 = vrot.slane %v368_v61, 2 }
 0x154   :  { %584 = vpush %v149_v28 }
 0x155   :  { %v370_v4 = vadd.f32 %v369_v3, %v368_v61 }
 0x157   :  { %v371_v13 = vrot.slane %v370_v4, 1 }
 0x159   :  { %v372_v22 = vadd.f32 %v371_v13, %v370_v4 }
 0x16a   :  { %s583_s22 = spop %582 }
 0x16b   :  { %p135_p0 = scmp.gt.f32.partialorder %s581_s4, %s583_s22 }
 0x16d   :  { %s136_s24 = scalar_select %p135_p0, 1, 0 }
 0x16f   :  { %s137_s26 = scvt.s32.f32 %s136_s24 }
 0x171   :  { %v139_v46 = vstv %s137_s26 }
 0x172   :  { %v140_v49 = vmul.f32 %v139_v46, %v753_v56 }
 0x174   :  { %v165_v53 = vrot.slane %v140_v49, 1 }
 0x185   :  { %s585_s23 = spop %584 }
 0x186   :  { %v151_v29 = vstv %s585_s23 }
 0x187   :  { %608 = vrsqrt.f32 %v151_v29  ;;  %vm154_vm7 = vcmp.eq.f32.partialorder %v151_v29, inf  ;;  %v157_v36 = vand.u32 2147483648, %v151_v29  ;;  %vm156_vm8 = vcmp.eq.f32.partialorder %v151_v29, 0.0 }
 0x194   :  { %v609_v33 = vpop.eup %608 }
 0x195   :  { %v153_v37 = vmul.f32 %v609_v33, %v151_v29 }
 0x197   :  { %v155_v38 = vsel %vm154_vm7, %v151_v29, %v153_v37 }
 0x198   :  { %v158_v41 = vsel %vm156_vm8, %v157_v36, %v155_v38 }
 0x199   :  { %586 = vpush %v158_v41 }
 0x19a   :  { %588 = vpush %v880_v55  ;;  %v167_v55 = vadd.f32 %v165_v53, %v753_v56 }
 0x1c1   :  { %v290_v43 = vpop.xlane.xlu1 %289 }
 0x1c2   :  { %v291_v44 = vrot.slane %v290_v43, 4 }
 0x1c4   :  { %v292_v45 = vadd.f32 %v291_v44, %v290_v43 }
 0x1c6   :  { %v293_v47 = vrot.slane %v292_v45, 2 }
 0x1c8   :  { %v294_v48 = vadd.f32 %v293_v47, %v292_v45 }
 0x1ca   :  { %s587_s27 = spop %586  ;;  %v295_v50 = vrot.slane %v294_v48, 1 }
 0x1cb   :  { %s589_s28 = spop %588 }
 0x1cc   :  { %p161_p1 = scmp.gt.f32.partialorder %s587_s27, %s589_s28  ;;  %v296_v52 = vadd.f32 %v295_v50, %v294_v48 }
 0x1ce   :  { %s162_s29 = scalar_select %p161_p1, 1, 0  ;;  %590 = vpush %v296_v52 }
 0x1d0   :  { %s163_s30 = scvt.s32.f32 %s162_s29 }
 0x1d2   :  { %v168_v54 = vstv %s163_s30 }
 0x1d3   :  { %v907_v57 = vmul.f32 %v168_v54, %v167_v55 }
 0x1ff   :  { %s591_s6 = spop %590 }
 0x200   :  { %v298_v60 = vstv %s591_s6 }
 0x201   :  { %610 = vrsqrt.f32 %v298_v60  ;;  %vm301_vm9 = vcmp.eq.f32.partialorder %v298_v60, inf  ;;  %v304_v14 = vand.u32 2147483648, %v298_v60  ;;  %vm303_vm10 = vcmp.eq.f32.partialorder %v298_v60, 0.0 }
 0x20e   :  { %v611_v5 = vpop.eup %610 }
 0x20f   :  { %v300_v12 = vmul.f32 %v611_v5, %v298_v60 }
 0x211   :  { %v302_v21 = vsel %vm301_vm9, %v298_v60, %v300_v12 }
 0x212   :  { %v305_v56 = vsel %vm303_vm10, %v304_v14, %v302_v21 }
 0x213   :  { %592 = vpush %v305_v56 }
 0x214   :  { %594 = vpush %v308_v16 }
 0x215   :  { %596 = vpush %v372_v22 }
 0x244   :  { %s593_s7 = spop %592 }
 0x245   :  { %s595_s8 = spop %594 }
 0x246   :  { %p310_p2 = scmp.gt.f32.partialorder %s593_s7, %s595_s8  ;;  %s597_s9 = spop %596 }
 0x247   :  { %v374_v25 = vstv %s597_s9 }
 0x248   :  { %s311_s10 = scalar_select %p310_p2, 1, 0  ;;  %612 = vrsqrt.f32 %v374_v25  ;;  %vm377_vm11 = vcmp.eq.f32.partialorder %v374_v25, inf  ;;  %v380_v44 = vand.u32 2147483648, %v374_v25  ;;  %vm379_vm12 = vcmp.eq.f32.partialorder %v374_v25, 0.0 }
 0x24a   :  { %s312_s11 = scvt.s32.f32 %s311_s10 }
 0x24c   :  { %v326_v26 = vstv %s312_s11 }
 0x24d   :  { %v329_v28 = vmul.f32 %v326_v26, %v768_v8  ;;  %v327_v29 = vmul.f32 %v326_v26, %v762_v63  ;;  %v334_v33 = vmul.f32 %v326_v26, %v816_v42  ;;  %v328_v36 = vmul.f32 %v326_v26, %v773_v10 }
 0x24e   :  { %v336_v38 = vmul.f32 %v326_v26, %v837_v58  ;;  %v330_v41 = vmul.f32 %v326_v26, %v782_v17  ;;  %v338_v47 = vmul.f32 %v326_v26, %v855_v20  ;;  %v331_v48 = vmul.f32 %v326_v26, %v787_v18 }
 0x24f   :  { %404 = vrot.lane.b32.xlu1 %v329_v28, %s614_s25  ;;  %400 = vrot.lane.b32.xlu0 %v327_v29, %s614_s25  ;;  %v332_v49 = vmul.f32 %v326_v26, %v804_v32  ;;  %v333_v50 = vmul.f32 %v326_v26, %v799_v30  ;;  %v335_v52 = vmul.f32 %v326_v26, %v828_v51 }
 0x250   :  { %v337_v53 = vmul.f32 %v326_v26, %v846_v11 }
 0x253   :  { %414 = vrot.lane.b32.xlu1 %v334_v33, %s614_s25  ;;  %402 = vrot.lane.b32.xlu0 %v328_v36, %s614_s25 }
 0x255   :  { %v613_v37 = vpop.eup %612 }
 0x256   :  { %v376_v43 = vmul.f32 %v613_v37, %v374_v25 }
 0x257   :  { %418 = vrot.lane.b32.xlu1 %v336_v38, %s614_s25  ;;  %406 = vrot.lane.b32.xlu0 %v330_v41, %s614_s25 }
 0x258   :  { %v378_v45 = vsel %vm377_vm11, %v374_v25, %v376_v43 }
 0x259   :  { %v381_v46 = vsel %vm379_vm12, %v380_v44, %v378_v45 }
 0x25a   :  { %598 = vpush %v381_v46 }
 0x25b   :  { %600 = vpush %v891_v34  ;;  %422 = vrot.lane.b32.xlu1 %v338_v47, %s614_s25  ;;  %408 = vrot.lane.b32.xlu0 %v331_v48, %s614_s25  ;;  %v339_v34 = vmul.f32 %v326_v26, %v869_v40 }
 0x25f   :  { %410 = vrot.lane.b32.xlu0 %v332_v49, %s614_s25 }
 0x263   :  { %412 = vrot.lane.b32.xlu0 %v333_v50, %s614_s25 }
 0x267   :  { %416 = vrot.lane.b32.xlu0 %v335_v52, %s614_s25 }
 0x26b   :  { %420 = vrot.lane.b32.xlu0 %v337_v53, %s614_s25 }
 0x26f   :  { %424 = vrot.lane.b32.xlu0 %v339_v34, %s614_s25 }
 0x28b   :  { %s599_s12 = spop %598 }
 0x28c   :  { %s601_s13 = spop %600 }
 0x28d   :  { %p384_p3 = scmp.gt.f32.partialorder %s599_s12, %s601_s13 }
 0x28f   :  { %s385_s14 = scalar_select %p384_p3, 1, 0 }
 0x291   :  { %s386_s15 = scvt.s32.f32 %s385_s14 }
 0x293   :  { %v452_v59 = vstv %s386_s15 }
 0x2c1   :  { %v405_v55 = vpop.permute.xlu1 %404  ;;  %v401_v54 = vpop.permute.xlu0 %400 }
 0x2c2   :  { %v439_v62 = vadd.f32 %v401_v54, %v762_v63  ;;  %v441_v60 = vadd.f32 %v405_v55, %v768_v8 }
 0x2c4   :  { %v453_v61 = vmul.f32 %v452_v59, %v439_v62  ;;  %v455_v5 = vmul.f32 %v452_v59, %v441_v60 }
 0x2c5   :  { %v403_v3 = vpop.permute.xlu0 %402  ;;  %v415_v21 = vpop.permute.xlu1 %414 }
 0x2c6   :  { %v440_v4 = vadd.f32 %v403_v3, %v773_v10  ;;  %468 = vperm.xlu1 %604, %v453_v61   ;;  %v446_v25 = vadd.f32 %v415_v21, %v816_v42 }
 0x2c8   :  { %v454_v12 = vmul.f32 %v452_v59, %v440_v4  ;;  %v460_v29 = vmul.f32 %v452_v59, %v446_v25 }
 0x2c9   :  { %v407_v13 = vpop.permute.xlu0 %406  ;;  %v419_v10 = vpop.permute.xlu1 %418 }
 0x2ca   :  { %v442_v14 = vadd.f32 %v407_v13, %v782_v17  ;;  %478 = vperm.xlu1 %604, %v455_v5   ;;  %473 = vperm.xlu0 %605, %v454_v12   ;;  %v448_v33 = vadd.f32 %v419_v10, %v837_v58 }
 0x2cc   :  { %v456_v16 = vmul.f32 %v452_v59, %v442_v14 }
 0x2cd   :  { %v409_v56 = vpop.permute.xlu0 %408  ;;  %v423_v37 = vpop.permute.xlu1 %422 }
 0x2ce   :  { %v443_v63 = vadd.f32 %v409_v56, %v787_v18  ;;  %483 = vperm.xlu1 %604, %v456_v16   ;;  %v450_v41 = vadd.f32 %v423_v37, %v855_v20 }
 0x2d0   :  { %v457_v22 = vmul.f32 %v452_v59, %v443_v63 }
 0x2d1   :  { %v411_v8 = vpop.permute.xlu0 %410 }
 0x2d2   :  { %v444_v24 = vadd.f32 %v411_v8, %v804_v32  ;;  %488 = vperm.xlu0 %605, %v457_v22   ;;  %v462_v32 = vmul.f32 %v452_v59, %v448_v33 }
 0x2d4   :  { %v458_v26 = vmul.f32 %v452_v59, %v444_v24 }
 0x2d5   :  { %v413_v28 = vpop.permute.xlu0 %412 }
 0x2d6   :  { %v445_v17 = vadd.f32 %v413_v28, %v799_v30  ;;  %493 = vperm.xlu1 %604, %v458_v26   ;;  %v464_v30 = vmul.f32 %v452_v59, %v450_v41 }
 0x2d8   :  { %v459_v36 = vmul.f32 %v452_v59, %v445_v17 }
 0x2d9   :  { %v417_v18 = vpop.permute.xlu0 %416 }
 0x2da   :  { %v447_v38 = vadd.f32 %v417_v18, %v828_v51  ;;  %503 = vperm.xlu1 %604, %v460_v29   ;;  %498 = vperm.xlu0 %605, %v459_v36   ;;  %v544_v51 = vlaneseq }
 0x2dc   :  { %v461_v43 = vmul.f32 %v452_v59, %v447_v38  ;;  %v545_v48 = vshrl.u32 %v544_v51, 7 }
 0x2dd   :  { %v421_v42 = vpop.permute.xlu0 %420 }
 0x2de   :  { %v449_v44 = vadd.f32 %v421_v42, %v846_v11  ;;  %513 = vperm.xlu1 %604, %v462_v32   ;;  %508 = vperm.xlu0 %605, %v461_v43   ;;  %v546_v49 = vsub.s32 0, %v545_v48 }
 0x2e0   :  { %v463_v45 = vmul.f32 %v452_v59, %v449_v44  ;;  %v547_v20 = vrot.slane %v907_v57, %v546_v49 }
 0x2e1   :  { %v425_v46 = vpop.permute.xlu0 %424 }
 0x2e2   :  { %v451_v58 = vadd.f32 %v425_v46, %v869_v40  ;;  %523 = vperm.xlu1 %604, %v464_v30   ;;  %518 = vperm.xlu0 %605, %v463_v45  }
 0x2e4   :  { %v465_v47 = vmul.f32 %v452_v59, %v451_v58 }
 0x2e6   :  { %528 = vperm.xlu0 %605, %v465_v47  }
 0x341   :  { %v469_v50 = vpop.permute.xlu1 %468 }
 0x342   :  { %v531_v52 = vmul.f32 %v469_v50, %v649_v0 }
 0x344   :  { %v548_v11 = vmul.f32 %v547_v20, %v531_v52 }
 0x345   :  { %v479_v53 = vpop.permute.xlu1 %478  ;;  %v474_v34 = vpop.permute.xlu0 %473 }
 0x346   :  { %561 = vst.msk [vmem:[%s1020_s5] sm:$0xff] %vm46_vm0, %v548_v11  ;;  %v533_v40 = vmul.f32 %v479_v53, %v659_v2  ;;  %v532_v55 = vmul.f32 %v474_v34, %v654_v1 }
 0x348   :  { %v550_v54 = vmul.f32 %v547_v20, %v533_v40  ;;  %v549_v62 = vmul.f32 %v547_v20, %v532_v55 }
 0x349   :  { %v484_v59 = vpop.permute.xlu1 %483 }
 0x34a   :  { %563 = vst.msk [vmem:[%s1020_s5 + $0x10] sm:$0xff] %vm46_vm0, %v550_v54  ;;  %562 = vst.msk [vmem:[%s1020_s5 + $0x8] sm:$0xff] %vm46_vm0, %v549_v62  ;;  %v534_v0 = vmul.f32 %v484_v59, %v675_v7 }
 0x34c   :  { %v551_v57 = vmul.f32 %v547_v20, %v534_v0 }
 0x34d   :  { %v489_v60 = vpop.permute.xlu0 %488 }
 0x34e   :  { %564 = vst.msk [vmem:[%s1020_s5 + $0x18] sm:$0xff] %vm46_vm0, %v551_v57  ;;  %v535_v1 = vmul.f32 %v489_v60, %v670_v6 }
 0x350   :  { %v552_v2 = vmul.f32 %v547_v20, %v535_v1 }
 0x351   :  { %v494_v61 = vpop.permute.xlu1 %493 }
 0x352   :  { %565 = vst.msk [vmem:[%s1020_s5 + $0x20] sm:$0xff] %vm46_vm0, %v552_v2  ;;  %v536_v3 = vmul.f32 %v494_v61, %v682_v9 }
 0x354   :  { %v553_v4 = vmul.f32 %v547_v20, %v536_v3 }
 0x355   :  { %v504_v7 = vpop.permute.xlu1 %503  ;;  %v499_v5 = vpop.permute.xlu0 %498 }
 0x356   :  { %566 = vst.msk [vmem:[%s1020_s5 + $0x28] sm:$0xff] %vm46_vm0, %v553_v4  ;;  %v538_v12 = vmul.f32 %v504_v7, %v700_v19  ;;  %v537_v6 = vmul.f32 %v499_v5, %v692_v15 }
 0x358   :  { %v555_v13 = vmul.f32 %v547_v20, %v538_v12  ;;  %v554_v14 = vmul.f32 %v547_v20, %v537_v6 }
 0x359   :  { %v514_v16 = vpop.permute.xlu1 %513  ;;  %v509_v21 = vpop.permute.xlu0 %508 }
 0x35a   :  { %568 = vst.msk [vmem:[%s1020_s5 + $0x38] sm:$0xff] %vm46_vm0, %v555_v13  ;;  %567 = vst.msk [vmem:[%s1020_s5 + $0x30] sm:$0xff] %vm46_vm0, %v554_v14  ;;  %v540_v9 = vmul.f32 %v514_v16, %v716_v27  ;;  %v539_v19 = vmul.f32 %v509_v21, %v708_v23 }
 0x35c   :  { %v557_v56 = vmul.f32 %v547_v20, %v540_v9  ;;  %v556_v15 = vmul.f32 %v547_v20, %v539_v19 }
 0x35d   :  { %v524_v63 = vpop.permute.xlu1 %523  ;;  %v519_v22 = vpop.permute.xlu0 %518 }
 0x35e   :  { %570 = vst.msk [vmem:[%s1020_s5 + $0x48] sm:$0xff] %vm46_vm0, %v557_v56  ;;  %569 = vst.msk [vmem:[%s1020_s5 + $0x40] sm:$0xff] %vm46_vm0, %v556_v15  ;;  %v542_v8 = vmul.f32 %v524_v63, %v732_v35  ;;  %v541_v27 = vmul.f32 %v519_v22, %v724_v31 }
 0x360   :  { %v559_v24 = vmul.f32 %v547_v20, %v542_v8  ;;  %v558_v23 = vmul.f32 %v547_v20, %v541_v27 }
 0x361   :  { %v529_v10 = vpop.permute.xlu0 %528 }
 0x362   :  { %572 = vst.msk [vmem:[%s1020_s5 + $0x58] sm:$0xff] %vm46_vm0, %v559_v24  ;;  %571 = vst.msk [vmem:[%s1020_s5 + $0x50] sm:$0xff] %vm46_vm0, %v558_v23  ;;  %v543_v25 = vmul.f32 %v529_v10, %v740_v39 }
 0x364   :  { %v560_v26 = vmul.f32 %v547_v20, %v543_v25 }
 0x366   :  { %573 = vst.msk [vmem:[%s1020_s5 + $0x60] sm:$0xf] %vm70_vm1, %v560_v26 }

</bundles_post_ra>
